<compile_context>
chip_gen: v6e
topology: v6e:2x2x1
jax: 0.10.0
libtpu: 0.0.40
codegen_flags: <defaults>
</compile_context>

<pallas_src>
import functools

import jax
import jax.numpy as jnp
import numpy as np
from jax import lax
from jax.experimental import pallas as pl
from jax.experimental.pallas import tpu as pltpu

_LANES = 128
_TILE_R_MAX = 4096       # rows per grid step: 4096*128*4B = 2 MiB per f32 input per buffer
_SUBLANE_ALIGN = 32      # block sublane multiple safe for f32 / bf16 / fp8 packing


def _cdiv(a, b):
    return -(-a // b)


def _round_up(a, b):
    return _cdiv(a, b) * b


# ----------------------------------------------------------------------------
# Fused LS-loss kernel: per-split partial sums of (real-1)^2 and fake^2.
# ----------------------------------------------------------------------------
def _ls_loss_kernel(real_ref, fake_ref, o_ref, acc_r_ref, acc_f_ref, *,
                    tile_r, rows_real, rows_fake, nb_per_split):
    i = pl.program_id(0)          # "parallel" split (one per TensorCore on v7x)
    j = pl.program_id(1)          # reduction step within the split
    g = i * nb_per_split + j      # global row-block index
    groups = tile_r // 8

    @pl.when(j == 0)
    def _init():
        acc_r_ref[...] = jnp.zeros_like(acc_r_ref)
        acc_f_ref[...] = jnp.zeros_like(acc_f_ref)

    def _accumulate(x_ref, target, rows_valid, acc_ref):
        # Upcast in-kernel: bf16/f16 inputs stream at native width, math in f32
        # (v5e VPU has no bf16, so f32 math is required there anyway).
        d = x_ref[...].astype(jnp.float32) - target          # (tile_r, 128)

        def _add(err):
            sq = err * err
            # (tile_r,128) -> (tile_r//8, 8, 128): free vreg regrouping; the
            # axis-0 sum is plain VPU adds into a single-vreg (8,128) accumulator.
            acc_ref[...] += jnp.sum(sq.reshape(groups, 8, _LANES), axis=0)

        # Fast path: block fully inside this input's valid rows -> no masking.
        @pl.when((g + 1) * tile_r <= rows_valid)
        def _full():
            _add(d)

        # Boundary block (or block past this input's extent): mask invalid rows.
        @pl.when((g + 1) * tile_r > rows_valid)
        def _tail():
            row = g * tile_r + lax.broadcasted_iota(jnp.int32, (tile_r, _LANES), 0)
            _add(jnp.where(row < rows_valid, d, 0.0))

    _accumulate(real_ref, 1.0, rows_real, acc_r_ref)   # MSE(real, ones)
    _accumulate(fake_ref, 0.0, rows_fake, acc_f_ref)   # MSE(fake, zeros)

    @pl.when(j == pl.num_programs(1) - 1)
    def _finalize():
        o_ref[0, 0, :, :] = acc_r_ref[...]
        o_ref[0, 1, :, :] = acc_f_ref[...]


def _as_rows(x, pad_value, tile_r):
    """Lane-dense (rows, 128) view of x in its original dtype.

    Copy-free when x.size is a multiple of 128 and x is not tiny; otherwise pads
    the lane tail / tiny input with the MSE target (zero error contribution).
    """
    n = int(x.size)
    rows = _cdiv(n, _LANES)
    arr_rows = max(rows, tile_r)          # block sublane dim never exceeds array
    flat = x.reshape(-1)
    need = arr_rows * _LANES
    if need != n:
        # TODO(synk): a 1-D BlockSpec could avoid even this (rare) pad copy.
        flat = jnp.pad(flat, (0, need - n), constant_values=pad_value)
    return flat.reshape(arr_rows, _LANES)


# ----------------------------------------------------------------------------
# DiscriminatorLSLoss forward.
# ----------------------------------------------------------------------------
@functools.partial(jax.jit, static_argnames=("tile_r_max",))
def discriminator_ls_loss(real_preds, fake_preds, *, tile_r_max=_TILE_R_MAX):
    n_real = int(real_preds.size)
    n_fake = int(fake_preds.size)
    rows_real = _cdiv(n_real, _LANES)
    rows_fake = _cdiv(n_fake, _LANES)
    rows_max = max(rows_real, rows_fake)

    tile_r = min(_round_up(tile_r_max, _SUBLANE_ALIGN),
                 _round_up(rows_max, _SUBLANE_ALIGN))
    nb_total = _cdiv(rows_max, tile_r)
    nb_real = _cdiv(rows_real, tile_r)
    nb_fake = _cdiv(rows_fake, tile_r)
    # Leading "parallel" axis splits the stream across the 2 TensorCores on v7x;
    # on 1-TC chips (v5e/v6e) it is just a harmless serial outer loop.
    n_par = 2 if nb_total >= 2 else 1
    nb_per_split = _cdiv(nb_total, n_par)

    real_slab = _as_rows(real_preds, 1.0, tile_r)   # pad value == target -> zero error
    fake_slab = _as_rows(fake_preds, 0.0, tile_r)

    def real_map(i, j):   # clamp so an exhausted input issues no further DMAs
        return (jnp.minimum(i * nb_per_split + j, nb_real - 1), 0)

    def fake_map(i, j):
        return (jnp.minimum(i * nb_per_split + j, nb_fake - 1), 0)

    kernel = functools.partial(
        _ls_loss_kernel, tile_r=tile_r, rows_real=rows_real,
        rows_fake=rows_fake, nb_per_split=nb_per_split)

    partials = pl.pallas_call(
        kernel,
        out_shape=jax.ShapeDtypeStruct((n_par, 2, 8, _LANES), jnp.float32),
        grid=(n_par, nb_per_split),
        in_specs=[
            pl.BlockSpec((tile_r, _LANES), real_map),
            pl.BlockSpec((tile_r, _LANES), fake_map),
        ],
        out_specs=pl.BlockSpec((1, 2, 8, _LANES), lambda i, j: (i, 0, 0, 0)),
        scratch_shapes=[pltpu.VMEM((8, _LANES), jnp.float32),
                        pltpu.VMEM((8, _LANES), jnp.float32)],
        compiler_params=pltpu.CompilerParams(
            dimension_semantics=("parallel", "arbitrary"),
            vmem_limit_bytes=32 * 1024 * 1024),
    )(real_slab, fake_slab)

    # Tiny lane-dense finish in the wrapper (2 * n_par * 8 * 128 floats).
    sums = jnp.sum(partials, axis=(0, 2, 3))            # [sum(real-1)^2, sum(fake)^2]
    return 0.5 * (sums[0] / n_real + sums[1] / n_fake)


# ----------------------------------------------------------------------------
# Pure-JAX reference (MSE in f32; intentionally matches the kernel's f32 math).
# ----------------------------------------------------------------------------
def _ref_loss(real_preds, fake_preds):
    rp = real_preds.astype(jnp.float32)
    fp = fake_preds.astype(jnp.float32)
    return 0.5 * (jnp.mean((rp - 1.0) ** 2) + jnp.mean(fp ** 2))


if __name__ == "__main__":
    key = jax.random.PRNGKey(0)
    k1, k2, k3, k4 = jax.random.split(key, 4)

    # PatchGAN-style discriminator logits, PyTorch NCHW convention.
    real_preds = jax.random.normal(k1, (2, 4, 16, 16), jnp.float32)
    fake_preds = jax.random.normal(k2, (2, 4, 16, 16), jnp.float32)

    loss = jax.block_until_ready(discriminator_ls_loss(real_preds, fake_preds))
    np.testing.assert_allclose(np.asarray(loss),
                               np.asarray(_ref_loss(real_preds, fake_preds)),
                               rtol=1e-5, atol=1e-6)

    # Exercise multi-block streaming, the fast/masked paths, the parallel split
    # and asymmetric input sizes with a deliberately small tile.
    real_big = jax.random.normal(k3, (2, 4, 32, 32), jnp.float32)   # 8192 elems
    fake_odd = jax.random.normal(k4, (2, 4, 24, 24), jnp.float32)   # 4608 elems
    loss2 = jax.block_until_ready(
        discriminator_ls_loss(real_big, fake_odd, tile_r_max=32))
    np.testing.assert_allclose(np.asarray(loss2),
                               np.asarray(_ref_loss(real_big, fake_odd)),
                               rtol=1e-5, atol=1e-6)

    print("KERNEL_OK")
</pallas_src>

<mosaic_0001>
module attributes {stable_mosaic.version = 11 : i64} {
  func.func @_ls_loss_kernel(%arg0: i32, %arg1: i32, %arg2: memref<32x128xf32, #tpu.memory_space<vmem>>, %arg3: memref<32x128xf32, #tpu.memory_space<vmem>>, %arg4: memref<1x2x8x128xf32, #tpu.memory_space<vmem>>, %arg5: memref<8x128xf32, #tpu.memory_space<vmem>>, %arg6: memref<8x128xf32, #tpu.memory_space<vmem>>) attributes {dimension_semantics = [#tpu.dimension_semantics<parallel>, #tpu.dimension_semantics<arbitrary>], iteration_bounds = array<i64: 1, 1>, scalar_prefetch = 0 : i64, scratch_operands = 2 : i64, tpu.core_type = #tpu.core_type<tc>, window_params = [{transform_indices = @transform_0, window_bounds = array<i64: 32, 128>}, {transform_indices = @transform_1, window_bounds = array<i64: 32, 128>}, {transform_indices = @transform_2, window_bounds = array<i64: 1, 2, 8, 128>}]} {
    %c1_i32 = arith.constant 1 : i32
    %0 = arith.muli %arg0, %c1_i32 : i32
    %1 = arith.addi %0, %arg1 : i32
    %c0_i32 = arith.constant 0 : i32
    %2 = arith.cmpi eq, %arg1, %c0_i32 : i32
    %3 = arith.extui %2 : i1 to i32
    %c0_i32_0 = arith.constant 0 : i32
    %4 = arith.cmpi ne, %3, %c0_i32_0 : i32
    scf.if %4 {
      %cst_21 = arith.constant 0.000000e+00 : f32
      %34 = vector.broadcast %cst_21 : f32 to vector<8x128xf32>
      %c0_22 = arith.constant 0 : index
      %c0_23 = arith.constant 0 : index
      %35 = vector.load %arg5[%c0_22, %c0_23] : memref<8x128xf32, #tpu.memory_space<vmem>>, vector<8x128xf32>
      tpu.vector_store %arg5[%c0_22, %c0_23], %34 {strides = array<i32>} : memref<8x128xf32, #tpu.memory_space<vmem>>, vector<8x128xf32>,
      %cst_24 = arith.constant 0.000000e+00 : f32
      %36 = vector.broadcast %cst_24 : f32 to vector<8x128xf32>
      %c0_25 = arith.constant 0 : index
      %c0_26 = arith.constant 0 : index
      %37 = vector.load %arg6[%c0_25, %c0_26] : memref<8x128xf32, #tpu.memory_space<vmem>>, vector<8x128xf32>
      tpu.vector_store %arg6[%c0_25, %c0_26], %36 {strides = array<i32>} : memref<8x128xf32, #tpu.memory_space<vmem>>, vector<8x128xf32>,
    } else {
    }
    %c0 = arith.constant 0 : index
    %c0_1 = arith.constant 0 : index
    %5 = vector.load %arg2[%c0, %c0_1] : memref<32x128xf32, #tpu.memory_space<vmem>>, vector<32x128xf32>
    %cst = arith.constant 1.000000e+00 : f32
    %6 = vector.broadcast %cst : f32 to vector<32x128xf32>
    %7 = arith.subf %5, %6 : vector<32x128xf32>
    %c1_i32_2 = arith.constant 1 : i32
    %8 = arith.addi %1, %c1_i32_2 : i32
    %c32_i32 = arith.constant 32 : i32
    %9 = arith.muli %8, %c32_i32 : i32
    %c16_i32 = arith.constant 16 : i32
    %10 = arith.cmpi sle, %9, %c16_i32 : i32
    %11 = arith.extui %10 : i1 to i32
    %c0_i32_3 = arith.constant 0 : i32
    %12 = arith.cmpi ne, %11, %c0_i32_3 : i32
    scf.if %12 {
      %34 = arith.mulf %7, %7 : vector<32x128xf32>
      %c0_21 = arith.constant 0 : index
      %c0_22 = arith.constant 0 : index
      %35 = vector.load %arg5[%c0_21, %c0_22] : memref<8x128xf32, #tpu.memory_space<vmem>>, vector<8x128xf32>
      %36 = vector.shape_cast %34 : vector<32x128xf32> to vector<4x8x128xf32>
      %cst_23 = arith.constant dense<0.000000e+00> : vector<8x128xf32>
      %37 = vector.multi_reduction <add>, %36, %cst_23 [0] : vector<4x8x128xf32> to vector<8x128xf32>
      %38 = arith.addf %35, %37 : vector<8x128xf32>
      %c0_24 = arith.constant 0 : index
      %c0_25 = arith.constant 0 : index
      %39 = vector.load %arg5[%c0_24, %c0_25] : memref<8x128xf32, #tpu.memory_space<vmem>>, vector<8x128xf32>
      tpu.vector_store %arg5[%c0_24, %c0_25], %38 {strides = array<i32>} : memref<8x128xf32, #tpu.memory_space<vmem>>, vector<8x128xf32>,
    } else {
    }
    %c1_i32_4 = arith.constant 1 : i32
    %13 = arith.addi %1, %c1_i32_4 : i32
    %c32_i32_5 = arith.constant 32 : i32
    %14 = arith.muli %13, %c32_i32_5 : i32
    %c16_i32_6 = arith.constant 16 : i32
    %15 = arith.cmpi sgt, %14, %c16_i32_6 : i32
    %16 = arith.extui %15 : i1 to i32
    %c0_i32_7 = arith.constant 0 : i32
    %17 = arith.cmpi ne, %16, %c0_i32_7 : i32
    scf.if %17 {
      %c32_i32_21 = arith.constant 32 : i32
      %34 = arith.muli %1, %c32_i32_21 : i32
      %35 = tpu.iota {dimensions = array<i32: 0>} : vector<32x128xi32>
      %36 = vector.broadcast %34 : i32 to vector<32x128xi32>
      %37 = arith.addi %36, %35 : vector<32x128xi32>
      %c16_i32_22 = arith.constant 16 : i32
      %38 = vector.broadcast %c16_i32_22 : i32 to vector<32x128xi32>
      %39 = arith.cmpi slt, %37, %38 : vector<32x128xi32>
      %cst_23 = arith.constant 0.000000e+00 : f32
      %40 = vector.broadcast %cst_23 : f32 to vector<32x128xf32>
      %41 = arith.select %39, %7, %40 : vector<32x128xi1>, vector<32x128xf32>
      %42 = arith.mulf %41, %41 : vector<32x128xf32>
      %c0_24 = arith.constant 0 : index
      %c0_25 = arith.constant 0 : index
      %43 = vector.load %arg5[%c0_24, %c0_25] : memref<8x128xf32, #tpu.memory_space<vmem>>, vector<8x128xf32>
      %44 = vector.shape_cast %42 : vector<32x128xf32> to vector<4x8x128xf32>
      %cst_26 = arith.constant dense<0.000000e+00> : vector<8x128xf32>
      %45 = vector.multi_reduction <add>, %44, %cst_26 [0] : vector<4x8x128xf32> to vector<8x128xf32>
      %46 = arith.addf %43, %45 : vector<8x128xf32>
      %c0_27 = arith.constant 0 : index
      %c0_28 = arith.constant 0 : index
      %47 = vector.load %arg5[%c0_27, %c0_28] : memref<8x128xf32, #tpu.memory_space<vmem>>, vector<8x128xf32>
      tpu.vector_store %arg5[%c0_27, %c0_28], %46 {strides = array<i32>} : memref<8x128xf32, #tpu.memory_space<vmem>>, vector<8x128xf32>,
    } else {
    }
    %c0_8 = arith.constant 0 : index
    %c0_9 = arith.constant 0 : index
    %18 = vector.load %arg3[%c0_8, %c0_9] : memref<32x128xf32, #tpu.memory_space<vmem>>, vector<32x128xf32>
    %cst_10 = arith.constant 0.000000e+00 : f32
    %19 = vector.broadcast %cst_10 : f32 to vector<32x128xf32>
    %20 = arith.subf %18, %19 : vector<32x128xf32>
    %c1_i32_11 = arith.constant 1 : i32
    %21 = arith.addi %1, %c1_i32_11 : i32
    %c32_i32_12 = arith.constant 32 : i32
    %22 = arith.muli %21, %c32_i32_12 : i32
    %c16_i32_13 = arith.constant 16 : i32
    %23 = arith.cmpi sle, %22, %c16_i32_13 : i32
    %24 = arith.extui %23 : i1 to i32
    %c0_i32_14 = arith.constant 0 : i32
    %25 = arith.cmpi ne, %24, %c0_i32_14 : i32
    scf.if %25 {
      %34 = arith.mulf %20, %20 : vector<32x128xf32>
      %c0_21 = arith.constant 0 : index
      %c0_22 = arith.constant 0 : index
      %35 = vector.load %arg6[%c0_21, %c0_22] : memref<8x128xf32, #tpu.memory_space<vmem>>, vector<8x128xf32>
      %36 = vector.shape_cast %34 : vector<32x128xf32> to vector<4x8x128xf32>
      %cst_23 = arith.constant dense<0.000000e+00> : vector<8x128xf32>
      %37 = vector.multi_reduction <add>, %36, %cst_23 [0] : vector<4x8x128xf32> to vector<8x128xf32>
      %38 = arith.addf %35, %37 : vector<8x128xf32>
      %c0_24 = arith.constant 0 : index
      %c0_25 = arith.constant 0 : index
      %39 = vector.load %arg6[%c0_24, %c0_25] : memref<8x128xf32, #tpu.memory_space<vmem>>, vector<8x128xf32>
      tpu.vector_store %arg6[%c0_24, %c0_25], %38 {strides = array<i32>} : memref<8x128xf32, #tpu.memory_space<vmem>>, vector<8x128xf32>,
    } else {
    }
    %c1_i32_15 = arith.constant 1 : i32
    %26 = arith.addi %1, %c1_i32_15 : i32
    %c32_i32_16 = arith.constant 32 : i32
    %27 = arith.muli %26, %c32_i32_16 : i32
    %c16_i32_17 = arith.constant 16 : i32
    %28 = arith.cmpi sgt, %27, %c16_i32_17 : i32
    %29 = arith.extui %28 : i1 to i32
    %c0_i32_18 = arith.constant 0 : i32
    %30 = arith.cmpi ne, %29, %c0_i32_18 : i32
    scf.if %30 {
      %c32_i32_21 = arith.constant 32 : i32
      %34 = arith.muli %1, %c32_i32_21 : i32
      %35 = tpu.iota {dimensions = array<i32: 0>} : vector<32x128xi32>
      %36 = vector.broadcast %34 : i32 to vector<32x128xi32>
      %37 = arith.addi %36, %35 : vector<32x128xi32>
      %c16_i32_22 = arith.constant 16 : i32
      %38 = vector.broadcast %c16_i32_22 : i32 to vector<32x128xi32>
      %39 = arith.cmpi slt, %37, %38 : vector<32x128xi32>
      %cst_23 = arith.constant 0.000000e+00 : f32
      %40 = vector.broadcast %cst_23 : f32 to vector<32x128xf32>
      %41 = arith.select %39, %20, %40 : vector<32x128xi1>, vector<32x128xf32>
      %42 = arith.mulf %41, %41 : vector<32x128xf32>
      %c0_24 = arith.constant 0 : index
      %c0_25 = arith.constant 0 : index
      %43 = vector.load %arg6[%c0_24, %c0_25] : memref<8x128xf32, #tpu.memory_space<vmem>>, vector<8x128xf32>
      %44 = vector.shape_cast %42 : vector<32x128xf32> to vector<4x8x128xf32>
      %cst_26 = arith.constant dense<0.000000e+00> : vector<8x128xf32>
      %45 = vector.multi_reduction <add>, %44, %cst_26 [0] : vector<4x8x128xf32> to vector<8x128xf32>
      %46 = arith.addf %43, %45 : vector<8x128xf32>
      %c0_27 = arith.constant 0 : index
      %c0_28 = arith.constant 0 : index
      %47 = vector.load %arg6[%c0_27, %c0_28] : memref<8x128xf32, #tpu.memory_space<vmem>>, vector<8x128xf32>
      tpu.vector_store %arg6[%c0_27, %c0_28], %46 {strides = array<i32>} : memref<8x128xf32, #tpu.memory_space<vmem>>, vector<8x128xf32>,
    } else {
    }
    %c0_i32_19 = arith.constant 0 : i32
    %31 = arith.cmpi eq, %arg1, %c0_i32_19 : i32
    %32 = arith.extui %31 : i1 to i32
    %c0_i32_20 = arith.constant 0 : i32
    %33 = arith.cmpi ne, %32, %c0_i32_20 : i32
    scf.if %33 {
      %c0_21 = arith.constant 0 : index
      %c0_22 = arith.constant 0 : index
      %34 = vector.load %arg5[%c0_21, %c0_22] : memref<8x128xf32, #tpu.memory_space<vmem>>, vector<8x128xf32>
      %c0_23 = arith.constant 0 : index
      %c0_24 = arith.constant 0 : index
      %c0_25 = arith.constant 0 : index
      %c0_26 = arith.constant 0 : index
      %35 = vector.load %arg4[%c0_23, %c0_24, %c0_25, %c0_26] : memref<1x2x8x128xf32, #tpu.memory_space<vmem>>, vector<1x1x8x128xf32>
      %36 = vector.shape_cast %35 : vector<1x1x8x128xf32> to vector<8x128xf32>
      %37 = vector.shape_cast %34 : vector<8x128xf32> to vector<1x1x8x128xf32>
      tpu.vector_store %arg4[%c0_23, %c0_24, %c0_25, %c0_26], %37 {strides = array<i32>} : memref<1x2x8x128xf32, #tpu.memory_space<vmem>>, vector<1x1x8x128xf32>,
      %c0_27 = arith.constant 0 : index
      %c0_28 = arith.constant 0 : index
      %38 = vector.load %arg6[%c0_27, %c0_28] : memref<8x128xf32, #tpu.memory_space<vmem>>, vector<8x128xf32>
      %c0_29 = arith.constant 0 : index
      %c1 = arith.constant 1 : index
      %c0_30 = arith.constant 0 : index
      %c0_31 = arith.constant 0 : index
      %39 = vector.load %arg4[%c0_29, %c1, %c0_30, %c0_31] : memref<1x2x8x128xf32, #tpu.memory_space<vmem>>, vector<1x1x8x128xf32>
      %40 = vector.shape_cast %39 : vector<1x1x8x128xf32> to vector<8x128xf32>
      %41 = vector.shape_cast %38 : vector<8x128xf32> to vector<1x1x8x128xf32>
      tpu.vector_store %arg4[%c0_29, %c1, %c0_30, %c0_31], %41 {strides = array<i32>} : memref<1x2x8x128xf32, #tpu.memory_space<vmem>>, vector<1x1x8x128xf32>,
    } else {
    }
    return
  }
  func.func @transform_0(%arg0: i32, %arg1: i32) -> (i32, i32) {
    %c1_i32 = arith.constant 1 : i32
    %0 = arith.muli %arg0, %c1_i32 : i32
    %1 = arith.addi %0, %arg1 : i32
    %c0_i32 = arith.constant 0 : i32
    %2 = arith.minsi %1, %c0_i32 : i32
    %c0_i32_0 = arith.constant 0 : i32
    %c0_i32_1 = arith.constant 0 : i32
    return %2, %c0_i32_0 : i32, i32
  }
  func.func @transform_1(%arg0: i32, %arg1: i32) -> (i32, i32) {
    %c1_i32 = arith.constant 1 : i32
    %0 = arith.muli %arg0, %c1_i32 : i32
    %1 = arith.addi %0, %arg1 : i32
    %c0_i32 = arith.constant 0 : i32
    %2 = arith.minsi %1, %c0_i32 : i32
    %c0_i32_0 = arith.constant 0 : i32
    %c0_i32_1 = arith.constant 0 : i32
    return %2, %c0_i32_0 : i32, i32
  }
  func.func @transform_2(%arg0: i32, %arg1: i32) -> (i32, i32, i32, i32) {
    %c0_i32 = arith.constant 0 : i32
    %c0_i32_0 = arith.constant 0 : i32
    %c0_i32_1 = arith.constant 0 : i32
    %c0_i32_2 = arith.constant 0 : i32
    return %arg0, %c0_i32, %c0_i32_0, %c0_i32_1 : i32, i32, i32, i32
  }
}

</mosaic_0001>

<bundles_post_ra>
// kernel: discriminator_ls_loss.1
= control target key start
LH: loop header
LB: loop body
LE: loop exit
PB: predicated region body
PF: predicated region fallthrough
CT: control target
= control target key end

     0   :  { %s250_s0 = inlined_call_operand.vmem [shape: f32[32,128], index: 0, kind: input, shape index: {}]   ;;  %s251_s1 = inlined_call_operand.vmem [shape: f32[32,128], index: 1, kind: input, shape index: {}]   ;;  %s252_s2 = inlined_call_operand.vmem [shape: f32[1,2,8,128], index: 2, kind: output, shape index: {}]  }
   0x1   :  { %v82_v0 = vld [vmem:[%s250_s0] sm:$0xff]  ;;  %v83_v1 = vld [vmem:[%s250_s0 + $0x8] sm:$0xff] }
   0x2   :  { %v139_v2 = vld [vmem:[%s251_s1] sm:$0xff]  ;;  %v212_v3 = vadd.f32 -1.0, %v82_v0  ;;  %v213_v4 = vadd.f32 -1.0, %v83_v1  ;;  %v140_v5 = vld [vmem:[%s251_s1 + $0x8] sm:$0xff] }
   0x3   :  { %v178_v6 = vmul.f32 %v139_v2, %v139_v2  ;;  %v179_v7 = vmul.f32 %v140_v5, %v140_v5 }
   0x4   :  { %v129_v8 = vmul.f32 %v212_v3, %v212_v3  ;;  %v130_v9 = vmul.f32 %v213_v4, %v213_v4 }
   0x5   :  { %v183_v10 = vadd.f32 %v179_v7, %v178_v6 }
   0x6   :  { %v134_v11 = vadd.f32 %v130_v9, %v129_v8 }
   0x7   :  { %216 = vst [vmem:[%s252_s2 + $0x8] sm:$0xff] %v183_v10 }
   0x8   :  { %192 = vst [vmem:[%s252_s2] sm:$0xff] %v134_v11 }

</bundles_post_ra>
